<compile_context>
chip_gen: v6e
topology: v6e:2x2x1
jax: 0.10.0
libtpu: 0.0.40
codegen_flags: <defaults>
</compile_context>

<pallas_src>
import jax
import jax.numpy as jnp
from jax.experimental import pallas as pl
from jax.experimental.pallas import tpu as pltpu

_LANES = 128      # vreg lane width
_SUBLANES = 8     # f32 sublane grain


def _scale_kernel(x_ref, w_ref, o_ref):
    # x_ref: (block_rows, 128) VMEM tile.  w_ref: (1, 1) scalar in SMEM.
    # Broadcasted VPU multiply; do NOT "upgrade" this to pl.dot / jnp.dot —
    # K = 1, the op is memory bound, the MXU buys nothing here.
    w = w_ref[0, 0]
    # Multiply in the promoted dtype (e.g. f32 if x is bf16 and w is f32),
    # then cast only the result to the output dtype.
    o_ref[...] = (x_ref[...] * w).astype(o_ref.dtype)


def simple_linear(x, weight, *, max_block_rows=2048):
    """y = x @ weight.T, specialized to nn.Linear(1, 1, bias=False)."""
    batch, in_f = x.shape
    out_f, w_in = weight.shape
    if in_f != 1 or out_f != 1 or w_in != 1:
        # The kernel reads only w[0, 0] and never contracts over in_features,
        # so it is only valid for the 1x1 case.
        raise ValueError("simple_linear is specialized to nn.Linear(1, 1, bias=False)")

    n = batch
    out_dtype = x.dtype

    # ---- Tiny-batch fast path: a Pallas launch is pure overhead here. ------
    if n < _LANES * _SUBLANES:
        return (x * weight[0, 0]).astype(out_dtype)

    # ---- Lane-dense slab ----------------------------------------------------
    # rows of 128 lanes; pad (if at all) only to the next multiple of 128.
    rows = pl.cdiv(n, _LANES)
    padded = rows * _LANES
    needs_pad = padded != n

    x_flat = jnp.ravel(x)                      # (n,1) -> (n,): free reshape
    if needs_pad:
        # <=127 padded elements.  `allow_input_fusion` below lets a jitted
        # caller fuse this pad into the pallas_call input instead of
        # materializing a padded copy in HBM.
        x_flat = jnp.pad(x_flat, (0, padded - n))
    x2d = x_flat.reshape(rows, _LANES)         # free when needs_pad is False

    # ---- Block size / grid --------------------------------------------------
    # Guarantee >=2 blocks when there is more than one sublane-row of work, so
    # v7x's two TensorCores both get a share of the "parallel" grid axis.
    if rows > _SUBLANES:
        half = pl.cdiv(pl.cdiv(rows, 2), _SUBLANES) * _SUBLANES
        block_rows = min(max_block_rows, half)
    else:
        block_rows = rows                      # single full-array block
    num_blocks = pl.cdiv(rows, block_rows)     # last block may be partial (masked)
    grid = (num_blocks,)

    # Alias the padded temp into the output only when it really is a fresh
    # throwaway buffer; in the no-pad path x2d may be a view of the caller's x
    # and aliasing it would either clobber x or force a defensive copy.
    io_aliases = {0: 0} if needs_pad else {}

    out2d = pl.pallas_call(
        _scale_kernel,
        out_shape=jax.ShapeDtypeStruct((rows, _LANES), out_dtype),
        grid=grid,
        in_specs=[
            pl.BlockSpec((block_rows, _LANES), lambda i: (i, 0)),
            # Single scalar weight: keep it in SMEM instead of a padded VMEM tile.
            pl.BlockSpec(memory_space=pltpu.MemorySpace.SMEM),
        ],
        out_specs=pl.BlockSpec((block_rows, _LANES), lambda i: (i, 0)),
        input_output_aliases=io_aliases,
        compiler_params=pltpu.CompilerParams(
            dimension_semantics=("parallel",),
            # Let XLA fuse the producer of x2d (pad/reshape) into the call.
            allow_input_fusion=[True, False],
            # 2048x128 f32 blocks = ~4 MiB pipelined VMEM: within the default
            # scoped limit on every generation, so no vmem_limit_bytes needed.
        ),
    )(x2d, weight)

    if needs_pad:
        # TODO(synk): the trailing slice is one extra (read+write) pass over y;
        # unavoidable with a rectangular out_shape when n % 128 != 0.
        return out2d.reshape(padded)[:n].reshape(batch, out_f)
    return out2d.reshape(batch, out_f)


if __name__ == "__main__":
    key = jax.random.PRNGKey(0)
    kx, kw = jax.random.split(key)

    # Deterministic "parameter init" matching nn.Linear(1, 1, bias=False): (out=1, in=1).
    weight = jax.random.uniform(kw, (1, 1), dtype=jnp.float32, minval=-1.0, maxval=1.0)

    # batch=8    -> tiny-batch fast path (plain XLA multiply)
    # batch=2048 -> kernel, no-pad path (rows=16, grid=2 blocks)
    # batch=1500 -> kernel, padded path (rows=12, grid=2, partial last block, io-alias)
    for batch in (8, 2048, 1500):
        kx, sub = jax.random.split(kx)
        x = jax.random.normal(sub, (batch, 1), dtype=jnp.float32)

        y = simple_linear(x, weight)
        jax.block_until_ready(y)

        y_ref = x @ weight.T
        assert y.shape == (batch, 1)
        assert jnp.allclose(y, y_ref, atol=1e-6, rtol=1e-6)

    print("KERNEL_OK")
</pallas_src>

<mosaic_0001>
module attributes {stable_mosaic.version = 11 : i64} {
  func.func @_scale_kernel(%arg0: i32, %arg1: memref<8x128xf32, #tpu.memory_space<vmem>>, %arg2: memref<1x1xf32, #tpu.memory_space<smem>>, %arg3: memref<8x128xf32, #tpu.memory_space<vmem>>) attributes {dimension_semantics = [#tpu.dimension_semantics<parallel>], iteration_bounds = array<i64: 2>, scalar_prefetch = 0 : i64, scratch_operands = 0 : i64, tpu.core_type = #tpu.core_type<tc>, window_params = [{transform_indices = @transform_0, window_bounds = array<i64: 8, 128>}, {transform_indices = @transform_1, window_bounds = array<i64: 1, 1>}, {transform_indices = @transform_2, window_bounds = array<i64: 8, 128>}]} {
    %c0 = arith.constant 0 : index
    %c0_0 = arith.constant 0 : index
    %0 = memref.load %arg2[%c0, %c0_0] : memref<1x1xf32, #tpu.memory_space<smem>>
    %c0_1 = arith.constant 0 : index
    %c0_2 = arith.constant 0 : index
    %1 = vector.load %arg1[%c0_1, %c0_2] : memref<8x128xf32, #tpu.memory_space<vmem>>, vector<8x128xf32>
    %2 = vector.broadcast %0 : f32 to vector<8x128xf32>
    %3 = arith.mulf %1, %2 : vector<8x128xf32>
    %c0_3 = arith.constant 0 : index
    %c0_4 = arith.constant 0 : index
    %4 = vector.load %arg3[%c0_3, %c0_4] : memref<8x128xf32, #tpu.memory_space<vmem>>, vector<8x128xf32>
    tpu.vector_store %arg3[%c0_3, %c0_4], %3 {strides = array<i32>} : memref<8x128xf32, #tpu.memory_space<vmem>>, vector<8x128xf32>,
    return
  }
  func.func @transform_0(%arg0: i32) -> (i32, i32) {
    %c0_i32 = arith.constant 0 : i32
    %c0_i32_0 = arith.constant 0 : i32
    return %arg0, %c0_i32 : i32, i32
  }
  func.func @transform_1(%arg0: i32) -> (i32, i32) {
    %c0_i32 = arith.constant 0 : i32
    %c0_i32_0 = arith.constant 0 : i32
    %c0_i32_1 = arith.constant 0 : i32
    return %c0_i32, %c0_i32_0 : i32, i32
  }
  func.func @transform_2(%arg0: i32) -> (i32, i32) {
    %c0_i32 = arith.constant 0 : i32
    %c0_i32_0 = arith.constant 0 : i32
    return %arg0, %c0_i32 : i32, i32
  }
}

</mosaic_0001>

<bundles_post_ra>
// kernel: tpu_custom_call.1
= control target key start
LH: loop header
LB: loop body
LE: loop exit
PB: predicated region body
PF: predicated region fallthrough
CT: control target
= control target key end

     0   :  { %s562_s0 = inlined_call_operand.hbm [shape: f32[16,128], index: 0, kind: input, shape index: {}]   ;;  %s563_s1 = inlined_call_operand.<no memory space> [shape: f32[1,1], index: 1, kind: input, shape index: {}]   ;;  %s564_s2 = inlined_call_operand.hbm [shape: f32[16,128], index: 2, kind: output, shape index: {}]  }
   0x1   :  { %7 = sst [smem:[#allocation2]] %s563_s1 }
   0x2   :  { %8 = vsyncpa [#allocation4], 0 }
   0x3   :  { %10 = vsyncpa [#allocation4 + $0x1], 0 }
   0x4   :  { %11 = vsyncpa [#allocation5], 0 }
   0x5   :  { %13 = vsyncpa [#allocation5 + $0x1], 0  ;;  %s421_s11 = smov 0   ;;  %s423_s12 = smov 0  }
   0x6   :  { %s425_s13 = smov 0   ;;  %s427_s14 = smov 0  }
   0x7 LB: > { %s442_s1 = sadd.s32 4294967295, %s399_s14   ;;  %s249_s15 = sadd.s32 4294967294, %s399_s14   ;;  %s399_s14 = sphi %s427_s14, %s581_s14   ;;  %s395_s13 = sphi %s425_s13, %s580_s13   ;;  %s391_s12 = sphi %s423_s12, %s579_s12   ;;  %s387_s11 = sphi %s421_s11, %s578_s11  }
   0x8   : > { %s446_s16 = sadd.s32 1, %s399_s14   ;;  %s26_s17 = sadd.s32 1, %s395_s13 }
   0x9   : > { %s23_s18 = ssub.s32 %s399_s14, %s446_s16  ;;  %p33_p0 = scmp.ne.s32.totalorder %s395_s13, %s391_s12 }
   0xa   : > { %p24_p1 = scmp.eq.s32.totalorder %s23_s18, 0  ;;  %p34_p2 = scmp.eq.s32.totalorder %s399_s14, 0 }
   0xb   : > { %p39_p3 = scmp.ne.s32.totalorder %s391_s12, %s387_s11  ;;  %p40_p4 = scmp.eq.s32.totalorder %s442_s1, 0 }
   0xc   : > { %s458_s19 = scalar_select %p24_p1, %s395_s13, %s26_s17  }
   0xd   : > { %p460_p5 = por %p34_p2, %p33_p0  ;;  %p464_p6 = por %p40_p4, %p39_p3 }
   0xe   : > { %p84_p7 = scmp.eq.s32.totalorder %s442_s1, 1  ;;  %p90_p8 = scmp.eq.s32.totalorder %s249_s15, 1 }
   0xf   : > { %s568_s21 = scalar_select %p464_p6, 1, 0 }
  0x10   : > { %p273_p10 = scmp.lt.s32.totalorder %s399_s14, 2  ;;  %p471_p11 = por %p84_p7, %p33_p0 }
  0x11   : > { %p475_p12 = por %p90_p8, %p39_p3  ;;  %s113_s24 = sand.u32 1, %s395_s13  }
  0x12   : > { %s569_s22 = scalar_select %p471_p11, 1, 0 }
  0x13   : > { %s570_s23 = scalar_select %p475_p12, 1, 0 }
  0x14   : > { %s253_s25 = sshll.u32 %s399_s14, 7  ;;  %s252_s26 = sshll.u32 %s113_s24, 3 }
  0x15   : > { %s484_s29 = scalar_lea.hbm %s562_s0, %s253_s25  ;;  %s117_s30 = scalar_lea.vmem [#allocation3], %s252_s26 }
  0x16   : > { %s124_s3 = sshll.u32 %s117_s30, 4  ;;  %p488_p13 = pnand %p273_p10, %p460_p5  ;;  %s492_s3 = int_to_ptr.vmem [resolvable:$true] %s124_s3 }
  0x17   : > { %s114_s5 = scalar_lea.sflag [#allocation4], %s113_s24  ;;  %s307_s6 = scalar_lea.hbm %s484_s29, 128 }
  0x18   : > { %p308_p2 = scmp.ne.s32.totalorder %s484_s29, %s307_s6  ;;  %p309_p3 = pneg %p488_p13 }
  0x19   : > { %s312_s9 = scalar_lea.hbm %s562_s0, 256  ;;  %p313_p5 = scmp.lt.s32.totalorder %s484_s29, %s562_s0 }
  0x1a   : > { %p310_p4 = pnand %p309_p3, %p308_p2  ;;  %p314_p8 = scmp.lt.s32.totalorder %s312_s9, %s307_s6 }
  0x1c   : > { %p311_p7 = pneg %p310_p4  ;;  %p315_p10 = por %p314_p8, %p313_p5 }
  0x1e   : > { %p316_p9 = pnand %p315_p10, %p311_p7 }
  0x20   : > { %319 = shalt.err (!%p316_p9)
}
  0x21   : > { %s320_s17 = scalar_lea.vmem %s492_s3, 128  ;;  %s401_s18 = smov [#allocation3]  }
  0x22   : > { %p321_p0 = scmp.ne.s32.totalorder %s492_s3, %s320_s17  ;;  %s325_s20 = sshll.u32 %s401_s18, 4  ;;  %s326_s20 = int_to_ptr.vmem [resolvable:$false] %s325_s20 }
  0x23   : > { %s327_s24 = scalar_lea.vmem %s326_s20, 256  ;;  %p328_p4 = scmp.lt.s32.totalorder %s492_s3, %s326_s20 }
  0x24   : > { %p323_p1 = pnand %p321_p0, %p309_p3  ;;  %p329_p12 = scmp.lt.s32.totalorder %s327_s24, %s320_s17 }
  0x26   : > { %p324_p2 = pneg %p323_p1  ;;  %p330_p11 = por %p329_p12, %p328_p4 }
  0x28   : > { %p331_p6 = pnand %p330_p11, %p324_p2 }
  0x2a   : > { %334 = shalt.err (!%p331_p6)
}
  0x2b   : > { %268 = dma.hbm_to_vmem [thread:$0]  (!%p488_p13), %s484_s29, 128, %s492_s3, %s114_s5  }
  0x2c   : > { %p572_p9 = scmp.lt.s32.totalorder %s399_s14, 3  ;;  %p573_p7 = scmp.ge.s32.totalorder %s399_s14, 1 }
  0x2e   : > { %p130_p0 = pnand %p573_p7, %p572_p9 }
  0x2f   : > { %s519_s25 = sand.u32 (!%p130_p0), 1, %s391_s12   ;;  %p574_p6 = scmp.ne.s32.totalorder (!%p130_p0), %s568_s21, 0 }
  0x30   : > { %133 = sbr.rel (%p130_p0) target bundleno = 79 (0x4f), region = 28  ;;  %s255_s26 = sshll.u32 (!%p130_p0), %s519_s25, 3 }
  0x31   : > { %s136_s27 = scalar_lea.sflag (!%p130_p0), [#allocation4], %s519_s25  ;;  %s139_s28 = scalar_lea.vmem (!%p130_p0), [#allocation3], %s255_s26 }
  0x35   : > { %378 = dma.done.wait (%p574_p6), %s136_s27, 128  }
  0x36   : > { %380 = vsyncadd (%p574_p6), %s136_s27, 4294967168  ;;  %s160_s29 = sld [smem:[#allocation2]]  ;;  %s159_s30 = scalar_lea.vmem [#allocation6], %s255_s26  ;;  %v161_v0 = vld [vmem:[%s139_s28] sm:$0xff] }
  0x37   : > { %s179_s3 = sshll.u32 %s159_s30, 4  ;;  %s258_s4 = sshll.u32 %s442_s1, 7  ;;  %s180_s3 = int_to_ptr.vmem [resolvable:$true] %s179_s3 }
  0x38   : > { %s177_s7 = scalar_lea.hbm %s564_s2, %s258_s4  ;;  %s166_s8 = scalar_lea.sflag [#allocation5], %s519_s25 }
  0x39   : > { %s335_s9 = scalar_lea.vmem %s180_s3, 128  ;;  %p575_p12 = scmp.ne.s32.totalorder %s569_s22, 0 }
  0x3a   : > { %p336_p11 = scmp.ne.s32.totalorder %s180_s3, %s335_s9  ;;  %s402_s21 = smov [#allocation6]  }
  0x3b   : > { %s339_s10 = sshll.u32 %s402_s21, 4  ;;  %s340_s10 = int_to_ptr.vmem [resolvable:$false] %s339_s10 }
  0x3c   : > { %v162_v1 = vstv %s160_s29  ;;  %p337_p13 = pnand %p336_p11, %p575_p12  ;;  %s341_s15 = scalar_lea.vmem %s340_s10, 256 }
  0x3d   : > { %v163_v2 = vmul.f32 %v162_v1, %v161_v0  ;;  %p342_p3 = scmp.lt.s32.totalorder %s180_s3, %s340_s10  ;;  %p343_p5 = scmp.lt.s32.totalorder %s341_s15, %s335_s9 }
  0x3e   : > { %p338_p1 = pneg %p337_p13 }
  0x3f   : > { %164 = vst [vmem:[%s159_s30] sm:$0xff] %v163_v2  ;;  %p344_p8 = por %p343_p5, %p342_p3 }
  0x41   : > { %p345_p10 = pnand %p344_p8, %p338_p1 }
  0x43   : > { %348 = shalt.err (!%p345_p10)
}
  0x44   : > { %s349_s1 = scalar_lea.hbm %s177_s7, 128  ;;  %s353_s20 = scalar_lea.hbm %s564_s2, 256 }
  0x45   : > { %p350_p2 = scmp.ne.s32.totalorder %s177_s7, %s349_s1  ;;  %p354_p7 = scmp.lt.s32.totalorder %s177_s7, %s564_s2 }
  0x46   : > { %p355_p0 = scmp.lt.s32.totalorder %s353_s20, %s349_s1 }
  0x47   : > { %p351_p4 = pnand %p350_p2, %p575_p12 }
  0x48   : > { %p356_p6 = por %p355_p0, %p354_p7 }
  0x49   : > { %p352_p9 = pneg %p351_p4 }
  0x4b   : > { %p357_p11 = pnand %p356_p6, %p352_p9 }
  0x4d   : > { %360 = shalt.err (!%p357_p11)
}
  0x4e   : > { %263 = dma.vmem_to_hbm [thread:$0]  (%p575_p12), %s180_s3, 128, %s177_s7, %s166_s8  }
  0x4f PF: > { %s191_s26 = sand.u32 1, %s387_s11   ;;  %p576_p13 = scmp.ne.s32.totalorder %s570_s23, 0 }
  0x50   : > { %p577_p1 = scmp.ge.s32.totalorder %s399_s14, 2  ;;  %s192_s27 = scalar_lea.sflag [#allocation5], %s191_s26 }
  0x52   : > { %p270_p3 = pnand %p577_p1, %p576_p13 }
  0x54   : > { %p271_p5 = pneg %p270_p3 }
  0x56   : > { %382 = dma.done.wait (%p271_p5), %s192_s27, 128  }
  0x57   : > { %384 = vsyncadd (%p271_p5), %s192_s27, 4294967168  ;;  %p16_p8 = scmp.ge.s32.totalorder %s446_s16, 4   ;;  %s578_s11 = smov %s391_s12 }
  0x58   : > { %s579_s12 = smov %s395_s13  ;;  %s580_s13 = smov %s458_s19 }
  0x59   : > { %s581_s14 = smov %s446_s16  ;;  %18 = sbr.rel (!%p16_p8) target bundleno = 7 (0x7), region = 73 }
  0x5e   :  { %197 = vsyncpa [#allocation4], 1 }
  0x5f   :  { %199 = vsyncpa [#allocation4 + $0x1], 1 }
  0x60   :  { %200 = vsyncpa [#allocation5], 1 }
  0x61   :  { %202 = vsyncpa [#allocation5 + $0x1], 1 }

</bundles_post_ra>
